<compile_context>
chip_gen: v6e
topology: v6e:2x2x1
jax: 0.10.0
libtpu: 0.0.40
codegen_flags: <defaults>
</compile_context>

<pallas_src>
import functools

import jax
import jax.numpy as jnp
from jax import lax
from jax.experimental import pallas as pl
from jax.experimental.pallas import tpu as pltpu


def _round_up(x, m):
    return ((x + m - 1) // m) * m


def _default_vmem_limit():
    # Re-derive per TPU generation: ~3/4 of physical VMEM (v5e/v6e 128 MiB -> 96 MiB,
    # v7x 64 MiB -> 48 MiB), leaving headroom for double-buffered pipeline buffers.
    try:
        phys = pltpu.get_tpu_info().vmem_capacity_bytes
    except Exception:
        phys = 64 * 1024 * 1024
    return int(min(96 * 1024 * 1024, (phys * 3) // 4))


_VMEM_LIMIT = _default_vmem_limit()


# ----------------------------- Pallas kernels ------------------------------

def _pointwise_group_kernel(x_ref, w_ref, b_ref, o_ref):
    # x: (tm, C) bf16 | w: (1, C, d) bf16 | b: (1, 1, d) f32  ->  o: (1, tm, d) bf16
    o_ref[0] = (
        jnp.dot(x_ref[...], w_ref[0], preferred_element_type=jnp.float32) + b_ref[0]
    ).astype(o_ref.dtype)


def pallas_pointwise_heads(x, w_g, b_g, *, tm=1024, out_dtype=jnp.bfloat16):
    """Grouped 1x1-conv projection: x:(M,C) -> out:(G,M,d), out[g] = x @ w_g[g] + b_g[g].

    Output is written head-major (group-major) so every head's (rows, dim_head) slab is
    directly DMA-addressable by the attention kernel (no sub-128-lane slicing later).
    The group axis is innermost so the x row-tile stays resident across groups.
    """
    M, C = x.shape
    G, C2, d = w_g.shape
    assert C == C2
    if tm >= M:
        tm = M                      # full extent (allowed even if not a multiple of 8)
    else:
        tm = max(8, (tm // 8) * 8)  # second-minor block dim must be a multiple of 8
    grid = (pl.cdiv(M, tm), G)
    return pl.pallas_call(
        _pointwise_group_kernel,
        out_shape=jax.ShapeDtypeStruct((G, M, d), out_dtype),
        grid=grid,
        in_specs=[
            pl.BlockSpec((tm, C), lambda i, g: (i, 0)),
            pl.BlockSpec((1, C, d), lambda i, g: (g, 0, 0)),
            pl.BlockSpec((1, 1, d), lambda i, g: (g, 0, 0)),
        ],
        out_specs=pl.BlockSpec((1, tm, d), lambda i, g: (g, i, 0)),
        compiler_params=pltpu.CompilerParams(
            dimension_semantics=("parallel", "parallel"),
            vmem_limit_bytes=_VMEM_LIMIT,
        ),
    )(x, w_g, b_g)


def _attn_kernel(q_ref, k_ref, v_ref, wo_ref, b_ref, o_ref, acc_ref):
    # One (batch, q-tile, head) grid step; heads is the innermost "arbitrary" reduction
    # axis accumulating the fused to_out projection into a VMEM scratch.
    #   q:  (1, 1, tq, d)   bf16  (1/sqrt(d) scale folded into the q projection)
    #   k,v:(1, 1, Nk, d)   bf16
    #   wo: (1, d, dim_pad) bf16  (per-head slice of the zero-padded to_out weight)
    #   b:  (1, dim_pad)    f32
    #   o:  (1, tq, dim_pad) f32  |  acc: (tq, dim_pad) f32 scratch
    h = pl.program_id(2)

    @pl.when(h == 0)
    def _():
        acc_ref[...] = jnp.zeros_like(acc_ref)

    q = q_ref[0, 0]                 # (tq, d) bf16
    k = k_ref[0, 0]                 # (Nk, d) bf16
    v = v_ref[0, 0]                 # (Nk, d) bf16

    # scores: contract on d for both operands -> no transposed copy of k materialized
    s = lax.dot_general(q, k, (((1,), (1,)), ((), ())),
                        preferred_element_type=jnp.float32)            # (tq, Nk) f32
    s = s - jnp.max(s, axis=-1, keepdims=True)
    e = jnp.exp(s)
    # approximate reciprocal runs on the otherwise-idle EUP (softmax not bit-exact)
    p = (e * pl.reciprocal(jnp.sum(e, axis=-1, keepdims=True), approx=True)).astype(v.dtype)

    oh = jnp.dot(p, v, preferred_element_type=jnp.float32).astype(wo_ref.dtype)  # (tq, d)
    acc_ref[...] += jnp.dot(oh, wo_ref[0], preferred_element_type=jnp.float32)

    @pl.when(h == pl.num_programs(2) - 1)
    def _():
        o_ref[0] = (acc_ref[...] + b_ref[...]).astype(o_ref.dtype)      # lane-dense store


def pallas_attention_out(q, kv, w_out_g, b_out, *, heads, tq=256):
    """Multi-head attention with the to_out 1x1 projection fused in.

    q:       (heads, B, Nq, d)     bf16
    kv:      (2*heads, B, Nk, d)   bf16 (groups [0,heads) = k, [heads,2*heads) = v)
    w_out_g: (heads, d, dim_pad)   bf16 (dim zero-padded to a multiple of 128)
    b_out:   (1, dim_pad)          f32
    returns  (B, Nq, dim_pad)      f32
    """
    _, B, Nq, d = q.shape
    _, _, Nk, _ = kv.shape
    dim_pad = w_out_g.shape[-1]
    if tq >= Nq:
        tq = Nq
    else:
        tq = max(8, (tq // 8) * 8)
    grid = (B, pl.cdiv(Nq, tq), heads)
    return pl.pallas_call(
        _attn_kernel,
        out_shape=jax.ShapeDtypeStruct((B, Nq, dim_pad), jnp.float32),
        grid=grid,
        in_specs=[
            pl.BlockSpec((1, 1, tq, d), lambda b, qi, h: (h, b, qi, 0)),
            pl.BlockSpec((1, 1, Nk, d), lambda b, qi, h: (h, b, 0, 0)),
            pl.BlockSpec((1, 1, Nk, d), lambda b, qi, h: (heads + h, b, 0, 0)),
            pl.BlockSpec((1, d, dim_pad), lambda b, qi, h: (h, 0, 0)),
            pl.BlockSpec((1, dim_pad), lambda b, qi, h: (0, 0)),
        ],
        out_specs=pl.BlockSpec((1, tq, dim_pad), lambda b, qi, h: (b, qi, 0)),
        scratch_shapes=[pltpu.VMEM((tq, dim_pad), jnp.float32)],
        compiler_params=pltpu.CompilerParams(
            dimension_semantics=("parallel", "parallel", "arbitrary"),
            vmem_limit_bytes=_VMEM_LIMIT,
        ),
    )(q, kv, kv, w_out_g, b_out)


# ------------------------------ JAX glue ops -------------------------------

def depthwise_conv_nhwc(x, w_hwio, stride, padding):
    """x:(B,H,W,C), w:(k,k,1,C) depthwise conv (groups=C), no bias, NHWC layout."""
    # TODO(synk): depthwise 3x3 grouped conv stays on XLA (no clean Pallas equivalent here).
    C = x.shape[-1]
    return lax.conv_general_dilated(
        x, w_hwio,
        window_strides=(stride, stride),
        padding=[(padding, padding), (padding, padding)],
        dimension_numbers=("NHWC", "HWIO", "NHWC"),
        feature_group_count=C,
    )


# ------------------------------- Parameters ---------------------------------

def make_attention_params(key, dim, proj_kernel, heads, dim_head):
    """Raw, PyTorch-style parameters (bias-free depthwise & 1x1 convs, BN, to_out conv)."""
    inner = heads * dim_head
    ks = jax.random.split(key, 10)
    s = 0.05
    return {
        # depthwise weights stored directly in HWIO: (k, k, 1, dim)
        "dw_q_w": s * jax.random.normal(ks[0], (proj_kernel, proj_kernel, 1, dim), jnp.float32),
        "bn_q_gamma": 1.0 + s * jax.random.normal(ks[1], (dim,), jnp.float32),
        "bn_q_beta": s * jax.random.normal(ks[2], (dim,), jnp.float32),
        "bn_q_mean": jnp.zeros((dim,), jnp.float32),
        "bn_q_var": jnp.ones((dim,), jnp.float32),
        "pw_q_w": s * jax.random.normal(ks[3], (inner, dim), jnp.float32),       # (Cout, Cin)
        "dw_kv_w": s * jax.random.normal(ks[4], (proj_kernel, proj_kernel, 1, dim), jnp.float32),
        "bn_kv_gamma": 1.0 + s * jax.random.normal(ks[5], (dim,), jnp.float32),
        "bn_kv_beta": s * jax.random.normal(ks[6], (dim,), jnp.float32),
        "bn_kv_mean": jnp.zeros((dim,), jnp.float32),
        "bn_kv_var": jnp.ones((dim,), jnp.float32),
        "pw_kv_w": s * jax.random.normal(ks[7], (2 * inner, dim), jnp.float32),  # (Cout, Cin)
        "out_w": s * jax.random.normal(ks[8], (dim, inner), jnp.float32),        # (Cout, Cin)
        "out_b": s * jax.random.normal(ks[9], (dim,), jnp.float32),
    }


def fold_attention_params(raw, *, heads, dim_head, dim, eps=1e-5):
    """Fold eval-mode BatchNorm into the following 1x1 conv, fold the 1/sqrt(d) attention
    scale into the q projection, reorder the 1x1 weights head-major (so heads are
    DMA-addressable), cast MXU weights to bf16, and zero-pad the to_out projection to a
    lane-dense (multiple-of-128) output width."""
    inner = heads * dim_head
    scale = float(dim_head) ** -0.5
    dim_pad = _round_up(dim, 128)

    inv_q = raw["bn_q_gamma"] / jnp.sqrt(raw["bn_q_var"] + eps)
    shift_q = raw["bn_q_beta"] - raw["bn_q_mean"] * inv_q
    inv_kv = raw["bn_kv_gamma"] / jnp.sqrt(raw["bn_kv_var"] + eps)
    shift_kv = raw["bn_kv_beta"] - raw["bn_kv_mean"] * inv_kv

    w_q = (raw["pw_q_w"] * inv_q[None, :]).T * scale            # (dim, inner)
    b_q = (raw["pw_q_w"] @ shift_q) * scale                     # (inner,)
    w_kv = (raw["pw_kv_w"] * inv_kv[None, :]).T                 # (dim, 2*inner)
    b_kv = raw["pw_kv_w"] @ shift_kv                            # (2*inner,)

    w_out = jnp.zeros((inner, dim_pad), jnp.float32).at[:, :dim].set(raw["out_w"].T)
    b_out = jnp.zeros((dim_pad,), jnp.float32).at[:dim].set(raw["out_b"])

    return {
        "dw_q_w": raw["dw_q_w"],
        "dw_kv_w": raw["dw_kv_w"],
        # head-major, matmul-ready, bf16 MXU operands (biases applied in f32)
        "pw_q_w": w_q.reshape(dim, heads, dim_head).transpose(1, 0, 2).astype(jnp.bfloat16),
        "pw_q_b": b_q.reshape(heads, 1, dim_head).astype(jnp.float32),
        "pw_kv_w": w_kv.reshape(dim, 2 * heads, dim_head).transpose(1, 0, 2).astype(jnp.bfloat16),
        "pw_kv_b": b_kv.reshape(2 * heads, 1, dim_head).astype(jnp.float32),
        "out_w_g": w_out.reshape(heads, dim_head, dim_pad).astype(jnp.bfloat16),
        "out_b": b_out.reshape(1, dim_pad),
    }


# ------------------------------- Attention ---------------------------------

def attention_forward(x, params, *, proj_kernel, kv_proj_stride, heads, dim_head):
    """Equivalent of Attention.forward(x): x in NCHW, dropout=0, BatchNorm in eval mode."""
    b, dim, H, W = x.shape
    padding = proj_kernel // 2

    # Single layout pass at the module boundary; everything below is channels-last.
    x_nhwc = jnp.transpose(x, (0, 2, 3, 1))                               # (B, H, W, dim)

    # TODO(synk): BatchNorm2d uses running stats (eval mode); PyTorch training-mode
    #             batch statistics are not reproduced.
    q_dw = depthwise_conv_nhwc(x_nhwc, params["dw_q_w"], stride=1, padding=padding)
    kv_dw = depthwise_conv_nhwc(x_nhwc, params["dw_kv_w"], stride=kv_proj_stride,
                                padding=padding)
    Hk, Wk = kv_dw.shape[1], kv_dw.shape[2]
    Nq, Nk = H * W, Hk * Wk

    # 1x1 projections (BN folded) -> head-major bf16 slabs: (G, rows, dim_head)
    q_g = pallas_pointwise_heads(q_dw.reshape(b * Nq, dim).astype(jnp.bfloat16),
                                 params["pw_q_w"], params["pw_q_b"])
    kv_g = pallas_pointwise_heads(kv_dw.reshape(b * Nk, dim).astype(jnp.bfloat16),
                                  params["pw_kv_w"], params["pw_kv_b"])

    q_g = q_g.reshape(heads, b, Nq, dim_head)           # free reshape (already head-major)
    kv_g = kv_g.reshape(2 * heads, b, Nk, dim_head)     # groups [0,heads)=k, [heads,2h)=v

    # flash-tiled attention over (batch, q-tile, head) + fused to_out projection
    out_pad = pallas_attention_out(q_g, kv_g, params["out_w_g"], params["out_b"],
                                   heads=heads)         # (b, Nq, dim_pad) f32

    out = out_pad[:, :, :dim].reshape(b, H, W, dim)     # drop lane padding
    return jnp.transpose(out, (0, 3, 1, 2))             # back to NCHW (Dropout(0.0) == id)


# --------------------------------- main -------------------------------------

if __name__ == "__main__":
    B, DIM, H, W = 2, 16, 8, 8
    HEADS, DIM_HEAD = 2, 8
    PROJ_KERNEL, KV_PROJ_STRIDE = 3, 2

    key = jax.random.PRNGKey(0)
    kx, kp = jax.random.split(key)
    x = jax.random.normal(kx, (B, DIM, H, W), jnp.float32)
    raw_params = make_attention_params(kp, DIM, PROJ_KERNEL, HEADS, DIM_HEAD)
    params = fold_attention_params(raw_params, heads=HEADS, dim_head=DIM_HEAD, dim=DIM)

    fwd = jax.jit(functools.partial(
        attention_forward,
        proj_kernel=PROJ_KERNEL,
        kv_proj_stride=KV_PROJ_STRIDE,
        heads=HEADS,
        dim_head=DIM_HEAD,
    ))
    out = fwd(x, params)
    jax.block_until_ready(out)
    assert out.shape == (B, DIM, H, W), out.shape
    print("KERNEL_OK")
</pallas_src>

<mosaic_0001>
module attributes {stable_mosaic.version = 11 : i64} {
  func.func @_pointwise_group_kernel(%arg0: i32, %arg1: i32, %arg2: memref<32x16xbf16, #tpu.memory_space<vmem>>, %arg3: memref<1x16x8xbf16, #tpu.memory_space<vmem>>, %arg4: memref<1x1x8xf32, #tpu.memory_space<vmem>>, %arg5: memref<1x32x8xbf16, #tpu.memory_space<vmem>>) attributes {dimension_semantics = [#tpu.dimension_semantics<parallel>, #tpu.dimension_semantics<parallel>], iteration_bounds = array<i64: 1, 4>, scalar_prefetch = 0 : i64, scratch_operands = 0 : i64, tpu.core_type = #tpu.core_type<tc>, window_params = [{transform_indices = @transform_0, window_bounds = array<i64: 32, 16>}, {transform_indices = @transform_1, window_bounds = array<i64: 1, 16, 8>}, {transform_indices = @transform_2, window_bounds = array<i64: 1, 1, 8>}, {transform_indices = @transform_3, window_bounds = array<i64: 1, 32, 8>}]} {
    %c0 = arith.constant 0 : index
    %c0_0 = arith.constant 0 : index
    %0 = vector.load %arg2[%c0, %c0_0] : memref<32x16xbf16, #tpu.memory_space<vmem>>, vector<32x16xbf16>
    %c0_1 = arith.constant 0 : index
    %c0_2 = arith.constant 0 : index
    %c0_3 = arith.constant 0 : index
    %1 = vector.load %arg3[%c0_1, %c0_2, %c0_3] : memref<1x16x8xbf16, #tpu.memory_space<vmem>>, vector<1x16x8xbf16>
    %2 = vector.shape_cast %1 : vector<1x16x8xbf16> to vector<16x8xbf16>
    %cst = arith.constant dense<0.000000e+00> : vector<32x8xf32>
    %3 = tpu.matmul %0, %2, %cst {dimension_numbers = #tpu.dot_dimension_numbers<[1], [0], [0], [1], [0, 0, 1, 1], [], []>} : vector<32x16xbf16>, vector<16x8xbf16>, vector<32x8xf32> -> vector<32x8xf32>
    %c0_4 = arith.constant 0 : index
    %c0_5 = arith.constant 0 : index
    %c0_6 = arith.constant 0 : index
    %4 = vector.load %arg4[%c0_4, %c0_5, %c0_6] : memref<1x1x8xf32, #tpu.memory_space<vmem>>, vector<1x1x8xf32>
    %5 = vector.shape_cast %4 : vector<1x1x8xf32> to vector<1x8xf32>
    %6 = vector.broadcast %5 : vector<1x8xf32> to vector<32x8xf32>
    %7 = arith.addf %3, %6 : vector<32x8xf32>
    %8 = arith.truncf %7 : vector<32x8xf32> to vector<32x8xbf16>
    %c0_7 = arith.constant 0 : index
    %c0_8 = arith.constant 0 : index
    %c0_9 = arith.constant 0 : index
    %9 = vector.load %arg5[%c0_7, %c0_8, %c0_9] : memref<1x32x8xbf16, #tpu.memory_space<vmem>>, vector<1x32x8xbf16>
    %10 = vector.shape_cast %9 : vector<1x32x8xbf16> to vector<32x8xbf16>
    %11 = vector.shape_cast %8 : vector<32x8xbf16> to vector<1x32x8xbf16>
    tpu.vector_store %arg5[%c0_7, %c0_8, %c0_9], %11 {strides = array<i32>} : memref<1x32x8xbf16, #tpu.memory_space<vmem>>, vector<1x32x8xbf16>,
    return
  }
  func.func @transform_0(%arg0: i32, %arg1: i32) -> (i32, i32) {
    %c0_i32 = arith.constant 0 : i32
    %c0_i32_0 = arith.constant 0 : i32
    return %arg0, %c0_i32 : i32, i32
  }
  func.func @transform_1(%arg0: i32, %arg1: i32) -> (i32, i32, i32) {
    %c0_i32 = arith.constant 0 : i32
    %c0_i32_0 = arith.constant 0 : i32
    %c0_i32_1 = arith.constant 0 : i32
    return %arg1, %c0_i32, %c0_i32_0 : i32, i32, i32
  }
  func.func @transform_2(%arg0: i32, %arg1: i32) -> (i32, i32, i32) {
    %c0_i32 = arith.constant 0 : i32
    %c0_i32_0 = arith.constant 0 : i32
    %c0_i32_1 = arith.constant 0 : i32
    return %arg1, %c0_i32, %c0_i32_0 : i32, i32, i32
  }
  func.func @transform_3(%arg0: i32, %arg1: i32) -> (i32, i32, i32) {
    %c0_i32 = arith.constant 0 : i32
    %c0_i32_0 = arith.constant 0 : i32
    return %arg1, %arg0, %c0_i32 : i32, i32, i32
  }
}

module attributes {stable_mosaic.version = 11 : i64} {
  func.func @_pointwise_group_kernel(%arg0: i32, %arg1: i32, %arg2: memref<128x16xbf16, #tpu.memory_space<vmem>>, %arg3: memref<1x16x8xbf16, #tpu.memory_space<vmem>>, %arg4: memref<1x1x8xf32, #tpu.memory_space<vmem>>, %arg5: memref<1x128x8xbf16, #tpu.memory_space<vmem>>) attributes {dimension_semantics = [#tpu.dimension_semantics<parallel>, #tpu.dimension_semantics<parallel>], iteration_bounds = array<i64: 1, 2>, scalar_prefetch = 0 : i64, scratch_operands = 0 : i64, tpu.core_type = #tpu.core_type<tc>, window_params = [{transform_indices = @transform_0, window_bounds = array<i64: 128, 16>}, {transform_indices = @transform_1, window_bounds = array<i64: 1, 16, 8>}, {transform_indices = @transform_2, window_bounds = array<i64: 1, 1, 8>}, {transform_indices = @transform_3, window_bounds = array<i64: 1, 128, 8>}]} {
    %c0 = arith.constant 0 : index
    %c0_0 = arith.constant 0 : index
    %0 = vector.load %arg2[%c0, %c0_0] : memref<128x16xbf16, #tpu.memory_space<vmem>>, vector<128x16xbf16>
    %c0_1 = arith.constant 0 : index
    %c0_2 = arith.constant 0 : index
    %c0_3 = arith.constant 0 : index
    %1 = vector.load %arg3[%c0_1, %c0_2, %c0_3] : memref<1x16x8xbf16, #tpu.memory_space<vmem>>, vector<1x16x8xbf16>
    %2 = vector.shape_cast %1 : vector<1x16x8xbf16> to vector<16x8xbf16>
    %cst = arith.constant dense<0.000000e+00> : vector<128x8xf32>
    %3 = tpu.matmul %0, %2, %cst {dimension_numbers = #tpu.dot_dimension_numbers<[1], [0], [0], [1], [0, 0, 1, 1], [], []>} : vector<128x16xbf16>, vector<16x8xbf16>, vector<128x8xf32> -> vector<128x8xf32>
    %c0_4 = arith.constant 0 : index
    %c0_5 = arith.constant 0 : index
    %c0_6 = arith.constant 0 : index
    %4 = vector.load %arg4[%c0_4, %c0_5, %c0_6] : memref<1x1x8xf32, #tpu.memory_space<vmem>>, vector<1x1x8xf32>
    %5 = vector.shape_cast %4 : vector<1x1x8xf32> to vector<1x8xf32>
    %6 = vector.broadcast %5 : vector<1x8xf32> to vector<128x8xf32>
    %7 = arith.addf %3, %6 : vector<128x8xf32>
    %8 = arith.truncf %7 : vector<128x8xf32> to vector<128x8xbf16>
    %c0_7 = arith.constant 0 : index
    %c0_8 = arith.constant 0 : index
    %c0_9 = arith.constant 0 : index
    %9 = vector.load %arg5[%c0_7, %c0_8, %c0_9] : memref<1x128x8xbf16, #tpu.memory_space<vmem>>, vector<1x128x8xbf16>
    %10 = vector.shape_cast %9 : vector<1x128x8xbf16> to vector<128x8xbf16>
    %11 = vector.shape_cast %8 : vector<128x8xbf16> to vector<1x128x8xbf16>
    tpu.vector_store %arg5[%c0_7, %c0_8, %c0_9], %11 {strides = array<i32>} : memref<1x128x8xbf16, #tpu.memory_space<vmem>>, vector<1x128x8xbf16>,
    return
  }
  func.func @transform_0(%arg0: i32, %arg1: i32) -> (i32, i32) {
    %c0_i32 = arith.constant 0 : i32
    %c0_i32_0 = arith.constant 0 : i32
    return %arg0, %c0_i32 : i32, i32
  }
  func.func @transform_1(%arg0: i32, %arg1: i32) -> (i32, i32, i32) {
    %c0_i32 = arith.constant 0 : i32
    %c0_i32_0 = arith.constant 0 : i32
    %c0_i32_1 = arith.constant 0 : i32
    return %arg1, %c0_i32, %c0_i32_0 : i32, i32, i32
  }
  func.func @transform_2(%arg0: i32, %arg1: i32) -> (i32, i32, i32) {
    %c0_i32 = arith.constant 0 : i32
    %c0_i32_0 = arith.constant 0 : i32
    %c0_i32_1 = arith.constant 0 : i32
    return %arg1, %c0_i32, %c0_i32_0 : i32, i32, i32
  }
  func.func @transform_3(%arg0: i32, %arg1: i32) -> (i32, i32, i32) {
    %c0_i32 = arith.constant 0 : i32
    %c0_i32_0 = arith.constant 0 : i32
    return %arg1, %arg0, %c0_i32 : i32, i32, i32
  }
}

module attributes {stable_mosaic.version = 11 : i64} {
  func.func @_attn_kernel(%arg0: i32, %arg1: i32, %arg2: i32, %arg3: memref<1x1x64x8xbf16, #tpu.memory_space<vmem>>, %arg4: memref<1x1x16x8xbf16, #tpu.memory_space<vmem>>, %arg5: memref<1x1x16x8xbf16, #tpu.memory_space<vmem>>, %arg6: memref<1x8x128xbf16, #tpu.memory_space<vmem>>, %arg7: memref<1x128xf32, #tpu.memory_space<vmem>>, %arg8: memref<1x64x128xf32, #tpu.memory_space<vmem>>, %arg9: memref<64x128xf32, #tpu.memory_space<vmem>>) attributes {dimension_semantics = [#tpu.dimension_semantics<parallel>, #tpu.dimension_semantics<parallel>, #tpu.dimension_semantics<arbitrary>], iteration_bounds = array<i64: 2, 1, 2>, scalar_prefetch = 0 : i64, scratch_operands = 1 : i64, tpu.core_type = #tpu.core_type<tc>, window_params = [{transform_indices = @transform_0, window_bounds = array<i64: 1, 1, 64, 8>}, {transform_indices = @transform_1, window_bounds = array<i64: 1, 1, 16, 8>}, {transform_indices = @transform_2, window_bounds = array<i64: 1, 1, 16, 8>}, {transform_indices = @transform_3, window_bounds = array<i64: 1, 8, 128>}, {pipeline_mode = #tpu.pipeline_mode<synchronous>, transform_indices = @transform_4, window_bounds = array<i64: 1, 128>}, {transform_indices = @transform_5, window_bounds = array<i64: 1, 64, 128>}]} {
    %c0_i32 = arith.constant 0 : i32
    %0 = arith.cmpi eq, %arg2, %c0_i32 : i32
    %1 = arith.extui %0 : i1 to i32
    %c0_i32_0 = arith.constant 0 : i32
    %2 = arith.cmpi ne, %1, %c0_i32_0 : i32
    scf.if %2 {
      %cst_24 = arith.constant 0.000000e+00 : f32
      %32 = vector.broadcast %cst_24 : f32 to vector<64x128xf32>
      %c0_25 = arith.constant 0 : index
      %c0_26 = arith.constant 0 : index
      %33 = vector.load %arg9[%c0_25, %c0_26] : memref<64x128xf32, #tpu.memory_space<vmem>>, vector<64x128xf32>
      tpu.vector_store %arg9[%c0_25, %c0_26], %32 {strides = array<i32>} : memref<64x128xf32, #tpu.memory_space<vmem>>, vector<64x128xf32>,
    } else {
    }
    %c0 = arith.constant 0 : index
    %c0_1 = arith.constant 0 : index
    %c0_2 = arith.constant 0 : index
    %c0_3 = arith.constant 0 : index
    %3 = vector.load %arg3[%c0, %c0_1, %c0_2, %c0_3] : memref<1x1x64x8xbf16, #tpu.memory_space<vmem>>, vector<1x1x64x8xbf16>
    %4 = vector.shape_cast %3 : vector<1x1x64x8xbf16> to vector<64x8xbf16>
    %c0_4 = arith.constant 0 : index
    %c0_5 = arith.constant 0 : index
    %c0_6 = arith.constant 0 : index
    %c0_7 = arith.constant 0 : index
    %5 = vector.load %arg4[%c0_4, %c0_5, %c0_6, %c0_7] : memref<1x1x16x8xbf16, #tpu.memory_space<vmem>>, vector<1x1x16x8xbf16>
    %6 = vector.shape_cast %5 : vector<1x1x16x8xbf16> to vector<16x8xbf16>
    %c0_8 = arith.constant 0 : index
    %c0_9 = arith.constant 0 : index
    %c0_10 = arith.constant 0 : index
    %c0_11 = arith.constant 0 : index
    %7 = vector.load %arg5[%c0_8, %c0_9, %c0_10, %c0_11] : memref<1x1x16x8xbf16, #tpu.memory_space<vmem>>, vector<1x1x16x8xbf16>
    %8 = vector.shape_cast %7 : vector<1x1x16x8xbf16> to vector<16x8xbf16>
    %cst = arith.constant dense<0.000000e+00> : vector<64x16xf32>
    %9 = tpu.matmul %4, %6, %cst {dimension_numbers = #tpu.dot_dimension_numbers<[1], [1], [0], [0], [0, 0, 1, 0], [], []>} : vector<64x8xbf16>, vector<16x8xbf16>, vector<64x16xf32> -> vector<64x16xf32>
    %cst_12 = arith.constant dense<0xFF800000> : vector<64xf32>
    %10 = vector.multi_reduction <maximumf>, %9, %cst_12 [1] : vector<64x16xf32> to vector<64xf32>
    %11 = vector.shape_cast %10 : vector<64xf32> to vector<64x1xf32>
    %12 = vector.broadcast %11 : vector<64x1xf32> to vector<64x16xf32>
    %13 = arith.subf %9, %12 : vector<64x16xf32>
    %14 = math.exp %13 : vector<64x16xf32>
    %cst_13 = arith.constant dense<0.000000e+00> : vector<64xf32>
    %15 = vector.multi_reduction <add>, %14, %cst_13 [1] : vector<64x16xf32> to vector<64xf32>
    %16 = vector.shape_cast %15 : vector<64xf32> to vector<64x1xf32>
    %17 = tpu.reciprocal %16 {approx = true} : vector<64x1xf32> -> vector<64x1xf32>
    %18 = vector.broadcast %17 : vector<64x1xf32> to vector<64x16xf32>
    %19 = arith.mulf %14, %18 : vector<64x16xf32>
    %20 = arith.truncf %19 : vector<64x16xf32> to vector<64x16xbf16>
    %cst_14 = arith.constant dense<0.000000e+00> : vector<64x8xf32>
    %21 = tpu.matmul %20, %8, %cst_14 {dimension_numbers = #tpu.dot_dimension_numbers<[1], [0], [0], [1], [0, 0, 1, 1], [], []>} : vector<64x16xbf16>, vector<16x8xbf16>, vector<64x8xf32> -> vector<64x8xf32>
    %22 = arith.truncf %21 : vector<64x8xf32> to vector<64x8xbf16>
    %c0_15 = arith.constant 0 : index
    %c0_16 = arith.constant 0 : index
    %23 = vector.load %arg9[%c0_15, %c0_16] : memref<64x128xf32, #tpu.memory_space<vmem>>, vector<64x128xf32>
    %c0_17 = arith.constant 0 : index
    %c0_18 = arith.constant 0 : index
    %c0_19 = arith.constant 0 : index
    %24 = vector.load %arg6[%c0_17, %c0_18, %c0_19] : memref<1x8x128xbf16, #tpu.memory_space<vmem>>, vector<1x8x128xbf16>
    %25 = vector.shape_cast %24 : vector<1x8x128xbf16> to vector<8x128xbf16>
    %cst_20 = arith.constant dense<0.000000e+00> : vector<64x128xf32>
    %26 = tpu.matmul %22, %25, %cst_20 {dimension_numbers = #tpu.dot_dimension_numbers<[1], [0], [0], [1], [0, 0, 1, 1], [], []>} : vector<64x8xbf16>, vector<8x128xbf16>, vector<64x128xf32> -> vector<64x128xf32>
    %27 = arith.addf %23, %26 : vector<64x128xf32>
    %c0_21 = arith.constant 0 : index
    %c0_22 = arith.constant 0 : index
    %28 = vector.load %arg9[%c0_21, %c0_22] : memref<64x128xf32, #tpu.memory_space<vmem>>, vector<64x128xf32>
    tpu.vector_store %arg9[%c0_21, %c0_22], %27 {strides = array<i32>} : memref<64x128xf32, #tpu.memory_space<vmem>>, vector<64x128xf32>,
    %c1_i32 = arith.constant 1 : i32
    %29 = arith.cmpi eq, %arg2, %c1_i32 : i32
    %30 = arith.extui %29 : i1 to i32
    %c0_i32_23 = arith.constant 0 : i32
    %31 = arith.cmpi ne, %30, %c0_i32_23 : i32
    scf.if %31 {
      %c0_24 = arith.constant 0 : index
      %c0_25 = arith.constant 0 : index
      %32 = vector.load %arg9[%c0_24, %c0_25] : memref<64x128xf32, #tpu.memory_space<vmem>>, vector<64x128xf32>
      %c0_26 = arith.constant 0 : index
      %c0_27 = arith.constant 0 : index
      %33 = vector.load %arg7[%c0_26, %c0_27] : memref<1x128xf32, #tpu.memory_space<vmem>>, vector<1x128xf32>
      %34 = vector.broadcast %33 : vector<1x128xf32> to vector<64x128xf32>
      %35 = arith.addf %32, %34 : vector<64x128xf32>
      %c0_28 = arith.constant 0 : index
      %c0_29 = arith.constant 0 : index
      %c0_30 = arith.constant 0 : index
      %36 = vector.load %arg8[%c0_28, %c0_29, %c0_30] : memref<1x64x128xf32, #tpu.memory_space<vmem>>, vector<1x64x128xf32>
      %37 = vector.shape_cast %36 : vector<1x64x128xf32> to vector<64x128xf32>
      %38 = vector.shape_cast %35 : vector<64x128xf32> to vector<1x64x128xf32>
      tpu.vector_store %arg8[%c0_28, %c0_29, %c0_30], %38 {strides = array<i32>} : memref<1x64x128xf32, #tpu.memory_space<vmem>>, vector<1x64x128xf32>,
    } else {
    }
    return
  }
  func.func @transform_0(%arg0: i32, %arg1: i32, %arg2: i32) -> (i32, i32, i32, i32) {
    %c0_i32 = arith.constant 0 : i32
    %c0_i32_0 = arith.constant 0 : i32
    return %arg2, %arg0, %arg1, %c0_i32 : i32, i32, i32, i32
  }
  func.func @transform_1(%arg0: i32, %arg1: i32, %arg2: i32) -> (i32, i32, i32, i32) {
    %c0_i32 = arith.constant 0 : i32
    %c0_i32_0 = arith.constant 0 : i32
    %c0_i32_1 = arith.constant 0 : i32
    return %arg2, %arg0, %c0_i32, %c0_i32_0 : i32, i32, i32, i32
  }
  func.func @transform_2(%arg0: i32, %arg1: i32, %arg2: i32) -> (i32, i32, i32, i32) {
    %c2_i32 = arith.constant 2 : i32
    %0 = arith.addi %c2_i32, %arg2 : i32
    %c0_i32 = arith.constant 0 : i32
    %c0_i32_0 = arith.constant 0 : i32
    %c0_i32_1 = arith.constant 0 : i32
    return %0, %arg0, %c0_i32, %c0_i32_0 : i32, i32, i32, i32
  }
  func.func @transform_3(%arg0: i32, %arg1: i32, %arg2: i32) -> (i32, i32, i32) {
    %c0_i32 = arith.constant 0 : i32
    %c0_i32_0 = arith.constant 0 : i32
    %c0_i32_1 = arith.constant 0 : i32
    return %arg2, %c0_i32, %c0_i32_0 : i32, i32, i32
  }
  func.func @transform_4(%arg0: i32, %arg1: i32, %arg2: i32) -> (i32, i32) {
    %c0_i32 = arith.constant 0 : i32
    %c0_i32_0 = arith.constant 0 : i32
    %c0_i32_1 = arith.constant 0 : i32
    return %c0_i32, %c0_i32_0 : i32, i32
  }
  func.func @transform_5(%arg0: i32, %arg1: i32, %arg2: i32) -> (i32, i32, i32) {
    %c0_i32 = arith.constant 0 : i32
    %c0_i32_0 = arith.constant 0 : i32
    return %arg0, %arg1, %c0_i32 : i32, i32, i32
  }
}

</mosaic_0001>

<bundles_post_ra>
// kernel: attention_forward.4
= control target key start
LH: loop header
LB: loop body
LE: loop exit
PB: predicated region body
PF: predicated region fallthrough
CT: control target
= control target key end

     0   :  { %s550_s12 = smov 0   ;;  %s552_s13 = smov 0   ;;  %s592_s0 = inlined_call_operand.vmem [shape: bf16[32,16], index: 0, kind: input, shape index: {}]   ;;  %s593_s1 = inlined_call_operand.vmem [shape: bf16[4,16,8], index: 1, kind: input, shape index: {}]   ;;  %s594_s2 = inlined_call_operand.vmem [shape: f32[4,1,8], index: 2, kind: input, shape index: {}]   ;;  %s595_s3 = inlined_call_operand.vmem [shape: bf16[4,32,8], index: 3, kind: output, shape index: {}]  }
   0x1   :  { %s554_s14 = smov 0  }
   0x2 LB: > { %s22_s15 = sadd.s32 1, %s524_s13  ;;  %p447_p0 = scmp.ge.s32.totalorder %s528_s14, 1  ;;  %s528_s14 = sphi %s554_s14, %s13_s14   ;;  %s524_s13 = sphi %s552_s13, %s597_s13   ;;  %s520_s12 = sphi %s550_s12, %s596_s12  }
   0x3   : > { %p23_p1 = scmp.ge.s32.totalorder %s22_s15, 4  ;;  %p170_p2 = scmp.lt.s32.totalorder %s528_s14, 5 }
   0x5   : > { %s599_s15 = smov (%p23_p1, %s22_s15), 0  ;;  %p171_p3 = pnand %p447_p0, %p170_p2 }
   0x6   : > { %p212_p4 = scmp.lt.s32.totalorder (!%p171_p3), %s520_s12, 3 }
   0x7   : > { %174 = sbr.rel (%p171_p3) target bundleno = 224 (0xe0), region = 32 }
   0xc   : > { %v504_v0 = vld [vmem:[%s592_s0] sm:$0xff]   ;;  %vm260_vm0 = vcmask 130048   ;;  %s601_s12 = smov (!%p212_p4, %s520_s12), 3  ;;  %v505_v2 = vld [vmem:[%s592_s0 + $0x8] sm:$0xff]   ;;  %vm332_vm1 = vcmask 60416  }
   0xd   : > { %475 = vmatprep.mubr.msk.bf16.mxu0 %vm260_vm0, %v504_v0  ;;  %s464_s18 = sshll.u32 %s601_s12, 3  ;;  %s219_s26 = scalar_lea.vmem %s594_s2, %s601_s12 }
   0xe   : > { %s216_s21 = scalar_lea.vmem %s593_s1, %s464_s18  ;;  %v452_v3 = vld [vmem:[%s219_s26] ss:$0 sm:$0xff]  ;;  %s465_s27 = sshll.u32 %s601_s12, 4 }
   0xf   : > { %v503_v1 = vld [vmem:[%s216_s21] sm:$0xff]   ;;  %s228_s30 = scalar_lea.vmem %s595_s3, %s465_s27 }
  0x10   : > { %473 = vmatprep.subr.bf16.mxu0 %v503_v1 }
  0x11   : > { %474 = vmatpush3.bf16.msra.mxu0 %v503_v1 }
  0x14   : > { %476 = vmatmul.mubr.msk.bf16.vlgmr.msra.gmra.mxu0 %vm260_vm0, %v505_v2 }
  0xd4   : > { %v477_v4 = vpop.f32.mrf.mxu0 }
  0xd5   : > { %v310_v5 = vadd.f32 %v477_v4, %v452_v3 }
  0xd6   : > { %v301_v6 = vpop.f32.mrf.mxu0 }
  0xd7   : > { %v468_v7 = vpack.c.bf16 %v310_v5, %v310_v5  ;;  %v302_v8 = vadd.f32 %v452_v3, %v301_v6 }
  0xd8   : > { %v478_v9 = vpop.f32.mrf.mxu0 }
  0xd9   : > { %335 = vst.msk [vmem:[%s228_s30 + $0x8] sm:$0xf] %vm332_vm1, %v468_v7  ;;  %v466_v10 = vpack.c.bf16 %v302_v8, %v302_v8  ;;  %v313_v11 = vadd.f32 %v478_v9, %v452_v3 }
  0xda   : > { %v304_v12 = vpop.f32.mrf.mxu0 }
  0xdb   : > { %333 = vst.msk [vmem:[%s228_s30] sm:$0xf] %vm332_vm1, %v466_v10  ;;  %v469_v13 = vpack.c.bf16 %v313_v11, %v313_v11  ;;  %v305_v14 = vadd.f32 %v452_v3, %v304_v12 }
  0xdd   : > { %336 = vst.msk [vmem:[%s228_s30 + $0xc] sm:$0xf] %vm332_vm1, %v469_v13  ;;  %v467_v15 = vpack.c.bf16 %v305_v14, %v305_v14 }
  0xdf   : > { %334 = vst.msk [vmem:[%s228_s30 + $0x4] sm:$0xf] %vm332_vm1, %v467_v15 }
  0xe0 PF: > { %s13_s14 = sadd.s32 1, %s528_s14   ;;  %s596_s12 = smov %s524_s13 }
  0xe1   : > { %p10_p5 = scmp.ge.s32.totalorder %s13_s14, 6   ;;  %s597_s13 = smov %s599_s15 }
  0xe3   :  { %12 = sbr.rel (!%p10_p5) target bundleno = 2 (0x2), region = 68 }

// kernel: attention_forward.3
= control target key start
LH: loop header
LB: loop body
LE: loop exit
PB: predicated region body
PF: predicated region fallthrough
CT: control target
= control target key end

     0   :  { %s780_s12 = smov 0   ;;  %s782_s13 = smov 0   ;;  %s887_s0 = inlined_call_operand.vmem [shape: bf16[128,16], index: 0, kind: input, shape index: {}]   ;;  %s888_s1 = inlined_call_operand.vmem [shape: bf16[2,16,8], index: 1, kind: input, shape index: {}]   ;;  %s889_s2 = inlined_call_operand.vmem [shape: f32[2,1,8], index: 2, kind: input, shape index: {}]   ;;  %s890_s3 = inlined_call_operand.vmem [shape: bf16[2,128,8], index: 3, kind: output, shape index: {}]  }
   0x1   :  { %s784_s14 = smov 0  }
   0x2 LB: > { %s22_s15 = sadd.s32 1, %s754_s13  ;;  %p615_p0 = scmp.ge.s32.totalorder %s758_s14, 1  ;;  %s758_s14 = sphi %s784_s14, %s13_s14   ;;  %s754_s13 = sphi %s782_s13, %s892_s13   ;;  %s750_s12 = sphi %s780_s12, %s891_s12  }
   0x3   : > { %p23_p1 = scmp.ge.s32.totalorder %s22_s15, 2  ;;  %p170_p2 = scmp.lt.s32.totalorder %s758_s14, 3 }
   0x5   : > { %s894_s15 = smov (%p23_p1, %s22_s15), 0  ;;  %p171_p3 = pnand %p615_p0, %p170_p2 }
   0x6   : > { %p212_p4 = scmp.lt.s32.totalorder (!%p171_p3), %s750_s12, 1 }
   0x7   : > { %174 = sbr.rel (%p171_p3) target bundleno = 232 (0xe8), region = 32 }
   0xc   : > { %v728_v0 = vld [vmem:[%s887_s0] sm:$0xff]   ;;  %vm302_vm0 = vcmask 130048   ;;  %s896_s12 = smov (!%p212_p4, %s750_s12), 1  ;;  %v730_v3 = vld [vmem:[%s887_s0 + $0x8] sm:$0xff]   ;;  %v732_v5 = vld [vmem:[%s887_s0 + $0x10] sm:$0xff]   ;;  %vm488_vm1 = vcmask 60416  }
   0xd   : > { %v729_v1 = vld [vmem:[%s887_s0 + $0x20] sm:$0xff]   ;;  %685 = vmatprep.mubr.msk.bf16.mxu0 %vm302_vm0, %v728_v0  ;;  %s656_s20 = sshll.u32 %s896_s12, 3  ;;  %v731_v4 = vld [vmem:[%s887_s0 + $0x28] sm:$0xff]   ;;  %v733_v6 = vld [vmem:[%s887_s0 + $0x30] sm:$0xff]   ;;  %s219_s11 = scalar_lea.vmem %s889_s2, %s896_s12 }
   0xe   : > { %693 = vmatprep.mubr.msk.bf16.mxu1 %vm302_vm0, %v729_v1  ;;  %s216_s23 = scalar_lea.vmem %s888_s1, %s656_s20  ;;  %v734_v7 = vld [vmem:[%s887_s0 + $0x18] sm:$0xff]   ;;  %v620_v9 = vld [vmem:[%s219_s11] ss:$0 sm:$0xff]  ;;  %s657_s16 = sshll.u32 %s896_s12, 6 }
   0xf   : > { %v727_v2 = vld [vmem:[%s216_s23] sm:$0xff]   ;;  %v735_v8 = vld [vmem:[%s887_s0 + $0x38] sm:$0xff]   ;;  %s844_s19 = scalar_lea.vmem %s890_s3, %s657_s16 }
  0x10   : > { %683 = vmatprep.subr.bf16.mxu0 %v727_v2  ;;  %701 = vmatprep.subr.bf16.mxu1 %v727_v2 }
  0x11   : > { %684 = vmatpush3.bf16.msra.mxu0 %v727_v2  ;;  %702 = vmatpush3.bf16.msra.mxu1 %v727_v2 }
  0x14   : > { %686 = vmatmul.mubr.msk.bf16.vlgmr.msra.gmra.mxu0 %vm302_vm0, %v730_v3  ;;  %694 = vmatmul.mubr.msk.bf16.vlgmr.msra.gmra.mxu1 %vm302_vm0, %v731_v4 }
  0x15   : > { %689 = vmatprep.mubr.msk.bf16.mxu0 %vm302_vm0, %v732_v5  ;;  %697 = vmatprep.mubr.msk.bf16.mxu1 %vm302_vm0, %v733_v6 }
  0x1c   : > { %690 = vmatmul.mubr.msk.bf16.gmra.mxu0 %vm302_vm0, %v734_v7  ;;  %698 = vmatmul.mubr.msk.bf16.gmra.mxu1 %vm302_vm0, %v735_v8 }
  0xd4   : > { %v687_v10 = vpop.f32.mrf.mxu0  ;;  %v695_v11 = vpop.f32.mrf.mxu1 }
  0xd5   : > { %v370_v12 = vadd.f32 %v687_v10, %v620_v9  ;;  %v402_v13 = vadd.f32 %v695_v11, %v620_v9 }
  0xd6   : > { %v361_v14 = vpop.f32.mrf.mxu0  ;;  %v393_v15 = vpop.f32.mrf.mxu1 }
  0xd7   : > { %v660_v16 = vpack.c.bf16 %v370_v12, %v370_v12  ;;  %v668_v17 = vpack.c.bf16 %v402_v13, %v402_v13  ;;  %v362_v18 = vadd.f32 %v620_v9, %v361_v14  ;;  %v394_v19 = vadd.f32 %v620_v9, %v393_v15 }
  0xd8   : > { %v688_v20 = vpop.f32.mrf.mxu0  ;;  %v696_v21 = vpop.f32.mrf.mxu1 }
  0xd9   : > { %491 = vst.msk [vmem:[%s844_s19 + $0x8] sm:$0xf] %vm488_vm1, %v660_v16  ;;  %499 = vst.msk [vmem:[%s844_s19 + $0x28] sm:$0xf] %vm488_vm1, %v668_v17  ;;  %v658_v22 = vpack.c.bf16 %v362_v18, %v362_v18  ;;  %v666_v23 = vpack.c.bf16 %v394_v19, %v394_v19  ;;  %v373_v24 = vadd.f32 %v688_v20, %v620_v9 }
  0xda   : > { %v405_v25 = vadd.f32 %v696_v21, %v620_v9  ;;  %v364_v26 = vpop.f32.mrf.mxu0  ;;  %v396_v27 = vpop.f32.mrf.mxu1 }
  0xdb   : > { %489 = vst.msk [vmem:[%s844_s19] sm:$0xf] %vm488_vm1, %v658_v22  ;;  %497 = vst.msk [vmem:[%s844_s19 + $0x20] sm:$0xf] %vm488_vm1, %v666_v23  ;;  %v661_v28 = vpack.c.bf16 %v373_v24, %v373_v24  ;;  %v365_v30 = vadd.f32 %v620_v9, %v364_v26  ;;  %v397_v31 = vadd.f32 %v620_v9, %v396_v27 }
  0xdc   : > { %v669_v29 = vpack.c.bf16 %v405_v25, %v405_v25  ;;  %v691_v32 = vpop.f32.mrf.mxu0  ;;  %v699_v33 = vpop.f32.mrf.mxu1 }
  0xdd   : > { %492 = vst.msk [vmem:[%s844_s19 + $0xc] sm:$0xf] %vm488_vm1, %v661_v28  ;;  %v659_v34 = vpack.c.bf16 %v365_v30, %v365_v30  ;;  %v667_v35 = vpack.c.bf16 %v397_v31, %v397_v31  ;;  %v386_v36 = vadd.f32 %v691_v32, %v620_v9  ;;  %v418_v37 = vadd.f32 %v699_v33, %v620_v9 }
  0xde   : > { %500 = vst.msk [vmem:[%s844_s19 + $0x2c] sm:$0xf] %vm488_vm1, %v669_v29  ;;  %v377_v38 = vpop.f32.mrf.mxu0  ;;  %v409_v39 = vpop.f32.mrf.mxu1 }
  0xdf   : > { %490 = vst.msk [vmem:[%s844_s19 + $0x4] sm:$0xf] %vm488_vm1, %v659_v34  ;;  %498 = vst.msk [vmem:[%s844_s19 + $0x24] sm:$0xf] %vm488_vm1, %v667_v35  ;;  %v664_v40 = vpack.c.bf16 %v386_v36, %v386_v36  ;;  %v672_v41 = vpack.c.bf16 %v418_v37, %v418_v37  ;;  %v378_v42 = vadd.f32 %v620_v9, %v377_v38 }
  0xe0   : > { %v410_v43 = vadd.f32 %v620_v9, %v409_v39  ;;  %v692_v44 = vpop.f32.mrf.mxu0  ;;  %v700_v45 = vpop.f32.mrf.mxu1 }
  0xe1   : > { %495 = vst.msk [vmem:[%s844_s19 + $0x18] sm:$0xf] %vm488_vm1, %v664_v40  ;;  %503 = vst.msk [vmem:[%s844_s19 + $0x38] sm:$0xf] %vm488_vm1, %v672_v41  ;;  %v662_v46 = vpack.c.bf16 %v378_v42, %v378_v42  ;;  %v389_v48 = vadd.f32 %v692_v44, %v620_v9  ;;  %v421_v49 = vadd.f32 %v700_v45, %v620_v9 }
  0xe2   : > { %v670_v47 = vpack.c.bf16 %v410_v43, %v410_v43  ;;  %v380_v50 = vpop.f32.mrf.mxu0  ;;  %v412_v51 = vpop.f32.mrf.mxu1 }
  0xe3   : > { %493 = vst.msk [vmem:[%s844_s19 + $0x10] sm:$0xf] %vm488_vm1, %v662_v46  ;;  %v665_v52 = vpack.c.bf16 %v389_v48, %v389_v48  ;;  %v673_v53 = vpack.c.bf16 %v421_v49, %v421_v49  ;;  %v381_v54 = vadd.f32 %v620_v9, %v380_v50  ;;  %v413_v55 = vadd.f32 %v620_v9, %v412_v51 }
  0xe4   : > { %501 = vst.msk [vmem:[%s844_s19 + $0x30] sm:$0xf] %vm488_vm1, %v670_v47 }
  0xe5   : > { %496 = vst.msk [vmem:[%s844_s19 + $0x1c] sm:$0xf] %vm488_vm1, %v665_v52  ;;  %504 = vst.msk [vmem:[%s844_s19 + $0x3c] sm:$0xf] %vm488_vm1, %v673_v53  ;;  %v663_v56 = vpack.c.bf16 %v381_v54, %v381_v54  ;;  %v671_v57 = vpack.c.bf16 %v413_v55, %v413_v55 }
  0xe7   : > { %494 = vst.msk [vmem:[%s844_s19 + $0x14] sm:$0xf] %vm488_vm1, %v663_v56  ;;  %502 = vst.msk [vmem:[%s844_s19 + $0x34] sm:$0xf] %vm488_vm1, %v671_v57 }
  0xe8 PF: > { %s13_s14 = sadd.s32 1, %s758_s14   ;;  %s891_s12 = smov %s754_s13 }
  0xe9   : > { %p10_p5 = scmp.ge.s32.totalorder %s13_s14, 4   ;;  %s892_s13 = smov %s894_s15 }
  0xeb   :  { %12 = sbr.rel (!%p10_p5) target bundleno = 2 (0x2), region = 68 }

// kernel: attention_forward.5
= control target key start
LH: loop header
LB: loop body
LE: loop exit
PB: predicated region body
PF: predicated region fallthrough
CT: control target
= control target key end

     0   :  { %s1222_s18 = smov 0   ;;  %s1224_s19 = smov 0   ;;  %s1348_s0 = inlined_call_operand.vmem [shape: bf16[2,2,64,8], index: 0, kind: input, shape index: {}]   ;;  %s1349_s1 = inlined_call_operand.vmem [shape: bf16[4,2,16,8], index: 1, kind: input, shape index: {}, may-alias: {1,2}]   ;;  %s1350_s2 = inlined_call_operand.vmem [shape: bf16[4,2,16,8], index: 2, kind: input, shape index: {}, may-alias: {1,2}]   ;;  %s1351_s3 = inlined_call_operand.vmem [shape: bf16[2,8,128], index: 3, kind: input, shape index: {}]   ;;  %s1352_s4 = inlined_call_operand.vmem [shape: f32[1,128], index: 4, kind: input, shape index: {}]   ;;  %s1353_s5 = inlined_call_operand.vmem [shape: f32[2,64,128], index: 5, kind: output, shape index: {}]  }
   0x1   :  { %1354 = sst [smem:[#allocation4_spill]] %s1348_s0  ;;  %s1226_s20 = smov 0  }
   0x2   :  { %s1228_s21 = smov 0   ;;  %s1230_s22 = smov 0  }
   0x3 LB: > { %s27_s23 = sadd.s32 1, %s1181_s20  ;;  %s34_s24 = sadd.s32 1, %s1185_s21  ;;  %s1189_s22 = sphi %s1230_s22, %s15_s22   ;;  %s1185_s21 = sphi %s1228_s21, %s1361_s21   ;;  %s1181_s20 = sphi %s1226_s20, %s1360_s20   ;;  %s1177_s19 = sphi %s1224_s19, %s1359_s19   ;;  %s1173_s18 = sphi %s1222_s18, %s1358_s18  }
   0x4   : > { %p28_p0 = scmp.ge.s32.totalorder %s27_s23, 2  ;;  %p986_p1 = scmp.ge.s32.totalorder %s1189_s22, 1 }
   0x5   : > { %p266_p2 = scmp.lt.s32.totalorder %s1189_s22, 5 }
   0x6   : > { %s1363_s23 = smov (%p28_p0, %s27_s23), 0  ;;  %s1365_s24 = smov (!%p28_p0, %s34_s24), %s1185_s21 }
   0x7   : > { %p267_p3 = pnand %p986_p1, %p266_p2  ;;  %p36_p4 = scmp.ge.s32.totalorder %s1365_s24, 2 }
   0x8   : > { %p330_p5 = scmp.lt.s32.totalorder (!%p267_p3), %s1173_s18, 1  ;;  %p332_p6 = scmp.lt.s32.totalorder (!%p267_p3), %s1177_s19, 1 }
   0x9   : > { %s1367_s24 = smov (%p36_p4, %s1365_s24), 0  ;;  %270 = sbr.rel (%p267_p3) target bundleno = 984 (0x3d8), region = 40 }
   0xa   : > { %1355 = sst [smem:[#allocation3_spill]] %s1367_s24  ;;  %p343_p7 = scmp.lt.s32.totalorder (!%p267_p3), %s1173_s18, 3 }
   0xb   : > { %s352_s25 = sadd.s32 (!%p267_p3), 2, %s1173_s18  ;;  %s1356_s0 = sld [smem:[#allocation4_spill]] (!%p267_p3) }
   0xc   : > { %p353_p8 = scmp.lt.s32.totalorder (!%p267_p3), %s352_s25, 3  ;;  %p999_p9 = scmp.ne.s32.totalorder (!%p267_p3), %s1173_s18, 0 }
   0xe   : > { %s331_s26 = scalar_select %p330_p5, %s1173_s18, 1 }
   0xf   : > { %s1369_s19 = smov (!%p332_p6, %s1177_s19), 1  ;;  %s1371_s25 = smov (!%p353_p8, %s352_s25), 3 }
  0x10   : > { %s988_s27 = sshll.u32 %s331_s26, 4  ;;  %s987_s28 = sshll.u32 %s1369_s19, 3 }
  0x11   : > { %s990_s29 = sshll.u32 %s1369_s19, 1  ;;  %s339_s30 = sadd.s32 %s988_s27, %s987_s28 }
  0x12   : > { %s996_s6 = sshll.u32 %s331_s26, 2  ;;  %s989_s7 = sshll.u32 %s339_s30, 2 }
  0x13   : > { %s1261_s10 = scalar_lea.vmem %s1351_s3, %s996_s6  ;;  %s1266_s13 = scalar_lea.vmem %s1356_s0, %s989_s7 }
  0x14   : > { %s1022_s14 = sshll.u32 %s1369_s19, 6  ;;  %s994_s28 = sshll.u32 %s1371_s25, 2 }
  0x15   : > { %s344_s15 = scalar_select %p343_p7, %s1173_s18, 3 }
  0x16   : > { %s1274_s26 = scalar_lea.vmem %s1353_s5, %s1022_s14  ;;  %s359_s6 = sadd.s32 %s994_s28, %s990_s29 }
  0x17   : > { %s991_s16 = sshll.u32 %s344_s15, 2  ;;  %s995_s7 = sshll.u32 %s359_s6, 2 }
  0x18   : > { %s349_s27 = sadd.s32 %s991_s16, %s990_s29  ;;  %s1282_s0 = scalar_lea.vmem %s1350_s2, %s995_s7 }
  0x19   : > { %s992_s30 = sshll.u32 %s349_s27, 2  ;;  %381 = sbr.rel (%p999_p9) target bundleno = 35 (0x23), region = 44 }
  0x1a   : > { %s351_s11 = scalar_lea.vmem %s1349_s1, %s992_s30 }
  0x1e   : > { %v1191_v0 = vmov 0.0  }
  0x1f   : > { %382 = vst [vmem:[#allocation2 + $0x30] sm:$0xff] %v1191_v0  ;;  %383 = vst [vmem:[#allocation2] sm:$0xff] %v1191_v0 }
  0x20   : > { %384 = vst [vmem:[#allocation2 + $0x18] sm:$0xff] %v1191_v0  ;;  %385 = vst [vmem:[#allocation2 + $0x10] sm:$0xff] %v1191_v0 }
  0x21   : > { %386 = vst [vmem:[#allocation2 + $0x8] sm:$0xff] %v1191_v0  ;;  %387 = vst [vmem:[#allocation2 + $0x20] sm:$0xff] %v1191_v0 }
  0x22   : > { %388 = vst [vmem:[#allocation2 + $0x28] sm:$0xff] %v1191_v0  ;;  %389 = vst [vmem:[#allocation2 + $0x38] sm:$0xff] %v1191_v0 }
  0x23 PF: > { %v1113_v1 = vld [vmem:[%s351_s11] sm:$0xff]   ;;  %vm427_vm0 = vcmask 64512   ;;  %v1115_v4 = vld [vmem:[%s1266_s13 + $0x8] sm:$0xff]   ;;  %v1116_v5 = vld [vmem:[%s1266_s13 + $0x10] sm:$0xff]   ;;  %vm508_vm1 = vcmask 130048   ;;  %vm709_vm2 = vcmask 1043456  }
  0x24   : > { %v1114_v2 = vld [vmem:[%s1266_s13] sm:$0xff]   ;;  %1070 = vmatprep.subr.msk.bf16.mxu0 %vm427_vm0, %v1113_v1  ;;  %v441_v3 = vsel %vm427_vm0, %v1113_v1, 0  ;;  %v1117_v6 = vld [vmem:[%s1266_s13 + $0x18] sm:$0xff]   ;;  %p1018_p10 = scmp.ne.s32.totalorder %s1173_s18, 1 }
  0x25   : > { %1039 = vmatpush3.bf16.xpose.msra.mxu0 %v441_v3  ;;  %1040 = vmatprep.mubr.msk.bf16.mxu0 %vm427_vm0, %v1114_v2  ;;  %v1118_v63 = vld [vmem:[%s1282_s0] sm:$0xff]  }
  0x26   : > { %1048 = vmatprep.subr.bf16.mxu0 %v1118_v63  ;;  %1068 = vmatprep.subr.bf16.mxu1 %v1118_v63 }
  0x27   : > { %1069 = vmatpush3.bf16.msra.mxu1 %v1118_v63 }
  0x2c   : > { %1041 = vmatmul.mubr.msk.bf16.vlgmr.msra.gmra.mxu0 %vm427_vm0, %v1115_v4 }
  0x2d   : > { %1044 = vmatprep.mubr.msk.bf16.mxu0 %vm427_vm0, %v1116_v5  ;;  %1049 = vmatpush3.bf16.msra.mxu0 %v1118_v63 }
  0x34   : > { %1045 = vmatmul.mubr.msk.bf16.gmra.mxu0 %vm427_vm0, %v1117_v6 }
  0xec   : > { %v1042_v7 = vpop.f32.mrf.mxu0 }
  0xed   : > { %v515_v8 = vsel %vm508_vm1, %v1042_v7, -inf }
  0xee   : > { %516 = vmax.xlane.f32.xlu1 %v515_v8  ;;  %v477_v9 = vpop.f32.mrf.mxu0 }
  0xef   : > { %v509_v10 = vsel %vm508_vm1, %v477_v9, -inf }
  0xf0   : > { %510 = vmax.xlane.f32.xlu0 %v509_v10  ;;  %v1043_v11 = vpop.f32.mrf.mxu0 }
  0xf1   : > { %v518_v12 = vsel %vm508_vm1, %v1043_v11, -inf }
  0xf2   : > { %519 = vmax.xlane.f32.xlu1 %v518_v12  ;;  %v480_v13 = vpop.f32.mrf.mxu0 }
  0xf3   : > { %v512_v14 = vsel %vm508_vm1, %v480_v13, -inf }
  0xf4   : > { %513 = vmax.xlane.f32.xlu0 %v512_v14  ;;  %v1046_v15 = vpop.f32.mrf.mxu0 }
  0xf5   : > { %v527_v20 = vsel %vm508_vm1, %v1046_v15, -inf }
  0xf6   : > { %v493_v16 = vpop.f32.mrf.mxu0 }
  0xf7   : > { %v521_v17 = vsel %vm508_vm1, %v493_v16, -inf }
  0xf8   : > { %522 = vmax.xlane.f32.xlu0 %v521_v17  ;;  %v1047_v18 = vpop.f32.mrf.mxu0 }
  0xf9   : > { %v530_v22 = vsel %vm508_vm1, %v1047_v18, -inf }
  0xfa   : > { %v496_v19 = vpop.f32.mrf.mxu0 }
  0xfb   : > { %v524_v21 = vsel %vm508_vm1, %v496_v19, -inf }
  0xfc   : > { %528 = vmax.xlane.f32.xlu0 %v527_v20  ;;  %525 = vmax.xlane.f32.xlu1 %v524_v21 }
 0x100   : > { %531 = vmax.xlane.f32.xlu1 %v530_v22 }
 0x177   : > { %v517_v23 = vpop.xlane.xlu1 %516 }
 0x178   : > { %v535_v24 = vsub.f32 %v1042_v7, %v517_v23 }
 0x179   : > { %v511_v25 = vpop.xlane.xlu0 %510 }
 0x17a   : > { %v533_v26 = vsub.f32 %v477_v9, %v511_v25  ;;  %v545_v28 = vmul.f32 1.442695, %v535_v24 }
 0x17b   : > { %v520_v27 = vpop.xlane.xlu1 %519 }
 0x17c   : > { %v541_v29 = vmul.f32 1.442695, %v533_v26  ;;  %v536_v30 = vsub.f32 %v1043_v11, %v520_v27 }
 0x17d   : > { %v514_v31 = vpop.xlane.xlu0 %513 }
 0x17e   : > { %1119 = vpow2.f32 %v541_v29  ;;  %v534_v32 = vsub.f32 %v480_v13, %v514_v31  ;;  %v547_v33 = vmul.f32 1.442695, %v536_v30 }
 0x17f   : > { %1121 = vpow2.f32 %v545_v28  ;;  %v696_v28 = vld [vmem:[%s1261_s10] sm:$0xf] }
 0x180   : > { %v543_v34 = vmul.f32 1.442695, %v534_v32  ;;  %1071 = vmatprep.subr.msk.bf16.mxu1 %vm709_vm2, %v696_v28  ;;  %v711_v29 = vsel %vm709_vm2, %v696_v28, 0 }
 0x181   : > { %v523_v35 = vpop.xlane.xlu0 %522 }
 0x182   : > { %1123 = vpow2.f32 %v543_v34  ;;  %v537_v36 = vsub.f32 %v493_v16, %v523_v35 }
 0x183   : > { %1125 = vpow2.f32 %v547_v33 }
 0x184   : > { %v549_v37 = vmul.f32 1.442695, %v537_v36 }
 0x185   : > { %v529_v38 = vpop.xlane.xlu0 %528  ;;  %v526_v39 = vpop.xlane.xlu1 %525 }
 0x186   : > { %1127 = vpow2.f32 %v549_v37  ;;  %v539_v40 = vsub.f32 %v1046_v15, %v529_v38  ;;  %v538_v41 = vsub.f32 %v496_v19, %v526_v39 }
 0x188   : > { %v553_v42 = vmul.f32 1.442695, %v539_v40  ;;  %v551_v43 = vmul.f32 1.442695, %v538_v41 }
 0x189   : > { %v532_v44 = vpop.xlane.xlu1 %531 }
 0x18a   : > { %1129 = vpow2.f32 %v553_v42  ;;  %v540_v45 = vsub.f32 %v1047_v18, %v532_v44  ;;  %v690_v42 = vld [vmem:[#allocation2 + $0x18] sm:$0xff]  ;;  %v688_v44 = vld [vmem:[#allocation2 + $0x30] sm:$0xff] }
 0x18b   : > { %v1120_v46 = vpop.eup %1119  ;;  %1131 = vpow2.f32 %v551_v43 }
 0x18c   : > { %v555_v47 = vmul.f32 1.442695, %v540_v45  ;;  %v557_v48 = vsel %vm508_vm1, %v1120_v46, 0.0  ;;  %v1122_v49 = vpop.eup %1121 }
 0x18d   : > { %558 = vadd.xlane.f32.xlu0 %v557_v48  ;;  %v563_v51 = vsel %vm508_vm1, %v1122_v49, 0.0 }
 0x18e   : > { %1133 = vpow2.f32 %v555_v47  ;;  %v691_v47 = vld [vmem:[#allocation2 + $0x10] sm:$0xff] }
 0x18f   : > { %v1124_v50 = vpop.eup %1123 }
 0x190   : > { %v560_v52 = vsel %vm508_vm1, %v1124_v50, 0.0  ;;  %v1126_v53 = vpop.eup %1125 }
 0x191   : > { %564 = vadd.xlane.f32.xlu0 %v563_v51  ;;  %561 = vadd.xlane.f32.xlu1 %v560_v52  ;;  %v566_v56 = vsel %vm508_vm1, %v1126_v53, 0.0 }
 0x193   : > { %v1128_v54 = vpop.eup %1127 }
 0x194   : > { %v569_v55 = vsel %vm508_vm1, %v1128_v54, 0.0 }
 0x195   : > { %570 = vadd.xlane.f32.xlu0 %v569_v55  ;;  %567 = vadd.xlane.f32.xlu1 %v566_v56  ;;  %v692_v56 = vld [vmem:[#allocation2 + $0x8] sm:$0xff] }
 0x197   : > { %v1130_v57 = vpop.eup %1129 }
 0x198   : > { %v1132_v58 = vpop.eup %1131  ;;  %v575_v59 = vsel %vm508_vm1, %v1130_v57, 0.0 }
 0x199   : > { %576 = vadd.xlane.f32.xlu0 %v575_v59  ;;  %v572_v60 = vsel %vm508_vm1, %v1132_v58, 0.0  ;;  %v695_v59 = vld [vmem:[#allocation2 + $0x38] sm:$0xff] }
 0x19a   : > { %573 = vadd.xlane.f32.xlu1 %v572_v60 }
 0x19b   : > { %v1134_v61 = vpop.eup %1133 }
 0x19c   : > { %v578_v62 = vsel %vm508_vm1, %v1134_v61, 0.0 }
 0x19e   : > { %579 = vadd.xlane.f32.xlu1 %v578_v62  ;;  %v693_v62 = vld [vmem:[#allocation2 + $0x20] sm:$0xff] }
 0x216   : > { %v559_v0 = vpop.xlane.xlu0 %558 }
 0x217   : > { %1135 = vrcp.f32 %v559_v0 }
 0x21a   : > { %v565_v1 = vpop.xlane.xlu0 %564  ;;  %v562_v2 = vpop.xlane.xlu1 %561 }
 0x21b   : > { %1137 = vrcp.f32 %v562_v2 }
 0x21c   : > { %1139 = vrcp.f32 %v565_v1 }
 0x21e   : > { %v571_v3 = vpop.xlane.xlu0 %570  ;;  %v568_v4 = vpop.xlane.xlu1 %567 }
 0x21f   : > { %1141 = vrcp.f32 %v568_v4 }
 0x220   : > { %1143 = vrcp.f32 %v571_v3 }
 0x222   : > { %v577_v5 = vpop.xlane.xlu0 %576 }
 0x223   : > { %v574_v6 = vpop.xlane.xlu1 %573 }
 0x224   : > { %1145 = vrcp.f32 %v574_v6  ;;  %v1136_v7 = vpop.eup %1135 }
 0x225   : > { %1147 = vrcp.f32 %v577_v5  ;;  %v589_v10 = vmul.f32 %v1136_v7, %v1120_v46 }
 0x227   : > { %v580_v8 = vpop.xlane.xlu1 %579 }
 0x228   : > { %1149 = vrcp.f32 %v580_v8  ;;  %v1138_v9 = vpop.eup %1137 }
 0x229   : > { %v590_v11 = vmul.f32 %v1138_v9, %v1124_v50  ;;  %v1140_v12 = vpop.eup %1139  ;;  %v689_v50 = vld [vmem:[#allocation2] sm:$0xff] }
 0x22a   : > { %v591_v15 = vmul.f32 %v1140_v12, %v1122_v49 }
 0x22b   : > { %v597_v13 = vpack.c.bf16 %v590_v11, %v589_v10 }
 0x22c   : > { %v1142_v14 = vpop.eup %1141 }
 0x22d   : > { %v592_v16 = vmul.f32 %v1142_v14, %v1126_v53  ;;  %1050 = vmatprep.mubr.msk.bf16.mxu0 %vm508_vm1, %v597_v13  ;;  %v1144_v17 = vpop.eup %1143  ;;  %v694_v53 = vld [vmem:[#allocation2 + $0x28] sm:$0xff] }
 0x22e   : > { %v593_v20 = vmul.f32 %v1144_v17, %v1128_v54 }
 0x22f   : > { %v598_v18 = vpack.c.bf16 %v592_v16, %v591_v15 }
 0x231   : > { %v1146_v19 = vpop.eup %1145  ;;  %1051 = vmatmul.mubr.msk.bf16.vlgmr.msra.gmra.mxu0 %vm508_vm1, %v598_v18 }
 0x232   : > { %v594_v21 = vmul.f32 %v1146_v19, %v1132_v58  ;;  %v1148_v22 = vpop.eup %1147 }
 0x233   : > { %v595_v25 = vmul.f32 %v1148_v22, %v1130_v57 }
 0x234   : > { %v599_v23 = vpack.c.bf16 %v594_v21, %v593_v20 }
 0x235   : > { %v1150_v24 = vpop.eup %1149 }
 0x236   : > { %1054 = vmatprep.mubr.msk.bf16.mxu1 %vm508_vm1, %v599_v23  ;;  %v596_v26 = vmul.f32 %v1150_v24, %v1134_v61 }
 0x238   : > { %v600_v27 = vpack.c.bf16 %v596_v26, %v595_v25 }
 0x23a   : > { %1055 = vmatmul.mubr.msk.bf16.vlgmr.msra.gmra.mxu1 %vm508_vm1, %v600_v27 }
 0x23b   : > { %1059 = vmatpush3.bf16.msra.mxu1 %v711_v29 }
 0x2f1   : > { %v1052_v30 = vpop.f32.mrf.mxu0 }
 0x2f3   : > { %v653_v31 = vpop.f32.mrf.mxu0 }
 0x2f5   : > { %v1053_v32 = vpop.f32.mrf.mxu0 }
 0x2f6   : > { %v685_v35 = vpack.c.bf16 %v1053_v32, %v1052_v30 }
 0x2f7   : > { %v656_v33 = vpop.f32.mrf.mxu0 }
 0x2f8   : > { %v684_v34 = vpack.c.bf16 %v656_v33, %v653_v31 }
 0x2fa   : > { %v1056_v36 = vpop.f32.mrf.mxu1  ;;  %1060 = vmatprep.mubr.msk.bf16.mxu1 %vm427_vm0, %v684_v34 }
 0x2fb   : > { %1061 = vmatmul.mubr.msk.bf16.vlgmr.msra.gmra.mxu1 %vm427_vm0, %v685_v35 }
 0x2fc   : > { %v669_v37 = vpop.f32.mrf.mxu1 }
 0x2fe   : > { %v1057_v38 = vpop.f32.mrf.mxu1 }
 0x2ff   : > { %v687_v41 = vpack.c.bf16 %v1057_v38, %v1056_v36 }
 0x300   : > { %v672_v39 = vpop.f32.mrf.mxu1 }
 0x301   : > { %v686_v40 = vpack.c.bf16 %v672_v39, %v669_v37 }
 0x303   : > { %1064 = vmatprep.mubr.msk.bf16.mxu1 %vm427_vm0, %v686_v40 }
 0x304   : > { %1065 = vmatmul.mubr.msk.bf16.gmra.mxu1 %vm427_vm0, %v687_v41 }
 0x3bb   : > { %v1062_v43 = vpop.f32.mrf.mxu1 }
 0x3bc   : > { %v780_v45 = vadd.f32 %v1062_v43, %v690_v42 }
 0x3bd   : > { %v747_v46 = vpop.f32.mrf.mxu1 }
 0x3be   : > { %788 = vst [vmem:[#allocation2 + $0x18] sm:$0xff] %v780_v45  ;;  %v778_v48 = vadd.f32 %v747_v46, %v688_v44 }
 0x3bf   : > { %v1063_v49 = vpop.f32.mrf.mxu1 }
 0x3c0   : > { %786 = vst [vmem:[#allocation2 + $0x30] sm:$0xff] %v778_v48  ;;  %v781_v51 = vadd.f32 %v1063_v49, %v691_v47 }
 0x3c1   : > { %v750_v52 = vpop.f32.mrf.mxu1 }
 0x3c2   : > { %789 = vst [vmem:[#allocation2 + $0x10] sm:$0xff] %v781_v51  ;;  %v779_v54 = vadd.f32 %v750_v52, %v689_v50 }
 0x3c4   : > { %v1066_v55 = vpop.f32.mrf.mxu1  ;;  %787 = vst [vmem:[#allocation2] sm:$0xff] %v779_v54 }
 0x3c5   : > { %v784_v57 = vadd.f32 %v1066_v55, %v694_v53 }
 0x3c6   : > { %v763_v58 = vpop.f32.mrf.mxu1 }
 0x3c7   : > { %792 = vst [vmem:[#allocation2 + $0x28] sm:$0xff] %v784_v57  ;;  %v782_v60 = vadd.f32 %v763_v58, %v692_v56 }
 0x3c8   : > { %v1067_v61 = vpop.f32.mrf.mxu1 }
 0x3c9   : > { %790 = vst [vmem:[#allocation2 + $0x8] sm:$0xff] %v782_v60  ;;  %v785_v63 = vadd.f32 %v1067_v61, %v695_v59  ;;  %797 = sbr.rel (%p1018_p10) target bundleno = 984 (0x3d8), region = 48 }
 0x3ca   : > { %v766_v0 = vpop.f32.mrf.mxu1 }
 0x3cb   : > { %793 = vst [vmem:[#allocation2 + $0x38] sm:$0xff] %v785_v63  ;;  %v783_v1 = vadd.f32 %v766_v0, %v693_v62 }
 0x3cd   : > { %791 = vst [vmem:[#allocation2 + $0x20] sm:$0xff] %v783_v1 }
 0x3ce   : > { %v798_v2 = vld [vmem:[#allocation2 + $0x30] sm:$0xff]  ;;  %v799_v4 = vld [vmem:[#allocation2] sm:$0xff]  ;;  %v800_v7 = vld [vmem:[#allocation2 + $0x18] sm:$0xff] }
 0x3cf   : > { %v1019_v3 = vld [vmem:[%s1352_s4] ss:$0 sm:$0xff]  ;;  %v804_v14 = vld [vmem:[#allocation2 + $0x28] sm:$0xff] }
 0x3d0   : > { %v813_v5 = vadd.f32 %v1019_v3, %v798_v2  ;;  %v814_v6 = vadd.f32 %v1019_v3, %v799_v4  ;;  %v801_v8 = vld [vmem:[#allocation2 + $0x10] sm:$0xff]  ;;  %v802_v9 = vld [vmem:[#allocation2 + $0x8] sm:$0xff]  ;;  %v815_v10 = vadd.f32 %v1019_v3, %v800_v7  ;;  %v819_v17 = vadd.f32 %v1019_v3, %v804_v14 }
 0x3d1   : > { %v816_v11 = vadd.f32 %v1019_v3, %v801_v8  ;;  %v817_v12 = vadd.f32 %v1019_v3, %v802_v9 }
 0x3d2   : > { %v805_v15 = vld [vmem:[#allocation2 + $0x38] sm:$0xff]  ;;  %821 = vst [vmem:[%s1274_s26] sm:$0xff] %v813_v5  ;;  %822 = vst [vmem:[%s1274_s26 + $0x8] sm:$0xff] %v814_v6 }
 0x3d3   : > { %v820_v18 = vadd.f32 %v1019_v3, %v805_v15  ;;  %823 = vst [vmem:[%s1274_s26 + $0x10] sm:$0xff] %v815_v10  ;;  %824 = vst [vmem:[%s1274_s26 + $0x18] sm:$0xff] %v816_v11 }
 0x3d4   : > { %v803_v13 = vld [vmem:[#allocation2 + $0x20] sm:$0xff]  ;;  %825 = vst [vmem:[%s1274_s26 + $0x20] sm:$0xff] %v817_v12  ;;  %827 = vst [vmem:[%s1274_s26 + $0x30] sm:$0xff] %v819_v17 }
 0x3d5   : > { %v818_v16 = vadd.f32 %v1019_v3, %v803_v13  ;;  %828 = vst [vmem:[%s1274_s26 + $0x38] sm:$0xff] %v820_v18 }
 0x3d7   : > { %826 = vst [vmem:[%s1274_s26 + $0x28] sm:$0xff] %v818_v16 }
 0x3d8 PF: > { %s15_s22 = sadd.s32 1, %s1189_s22   ;;  %s1357_s25 = sld [smem:[#allocation3_spill]] }
 0x3d9   : > { %p12_p11 = scmp.ge.s32.totalorder %s15_s22, 6   ;;  %s1358_s18 = smov %s1181_s20 }
 0x3da   : > { %s1359_s19 = smov %s1185_s21  ;;  %s1360_s20 = smov %s1363_s23 }
 0x3db   :  { %14 = sbr.rel (!%p12_p11) target bundleno = 3 (0x3), region = 87 }
 0x3de   : > { %s1361_s21 = smov %s1357_s25 }

</bundles_post_ra>
